<compile_context>
chip_gen: v7x
topology: tpu7x:2x2x1
jax: 0.10.0
libtpu: 0.0.40
codegen_flags: <defaults>
</compile_context>

<pallas_src>
import functools
import math

import jax
import jax.numpy as jnp
from jax.experimental import pallas as pl
from jax.experimental.pallas import tpu as pltpu

# ---- synthetic module configuration (small shapes) ----
D_MODEL = 32
NUM_HEADS = 4
HEAD_DIM = D_MODEL // NUM_HEADS
SEQ_LEN = 8
BATCH = 2
MAX_LEN = 64
SCALE = 10000
NEG_INF = -1e9


def _mha_kernel(x_ref, bias_ref, w_qkv_ref, b_qkv_ref, w_out_ref, b_out_ref,
                ctx_ref, wts_ref=None, *, num_heads):
    """Fused multi-head self-attention for one batch element (heads batched).

    x_ref     : (1, L, E)    activations (positional encoding pre-added)
    bias_ref  : (1, 1, L)    additive key-padding bias (0 keep / -1e9 pad)
    w_qkv_ref : (3, H, E, d) head-packed q|k|v projections, q pre-scaled
    b_qkv_ref : (3, H, 1, d) matching biases (q part pre-scaled)
    w_out_ref : (H, d, E)    head-packed output projection
    b_out_ref : (1, E)
    ctx_ref   : (1, L, E)    attention output
    wts_ref   : (1, L, L)    optional head-averaged attention weights
    """
    H = num_heads
    x = x_ref[0]                                          # (L, E)
    L, E = x.shape

    # heads as a leading batch dim for all dots (no lane slicing / relayouts)
    xh = jnp.broadcast_to(x[None, :, :], (H, L, E))

    q = jnp.einsum("hle,hed->hld", xh, w_qkv_ref[0],
                   preferred_element_type=jnp.float32) + b_qkv_ref[0]
    k = jnp.einsum("hle,hed->hld", xh, w_qkv_ref[1],
                   preferred_element_type=jnp.float32) + b_qkv_ref[1]
    v = jnp.einsum("hle,hed->hld", xh, w_qkv_ref[2],
                   preferred_element_type=jnp.float32) + b_qkv_ref[2]

    # scores for all heads in one batched dot (q already scaled by 1/sqrt(d))
    s = jnp.einsum("hld,hmd->hlm", q, k,
                   preferred_element_type=jnp.float32)    # (H, L, L)
    s = s + bias_ref[...]                                 # key-padding bias
    s = s - jnp.max(s, axis=-1, keepdims=True)
    p = jnp.exp(s)
    p = p * pl.reciprocal(jnp.sum(p, axis=-1, keepdims=True), approx=False)

    o = jnp.einsum("hlm,hmd->hld", p, v,
                   preferred_element_type=jnp.float32)    # (H, L, d)
    # per-head output projection in one batched dot, then a single head-sum
    ctx_h = jnp.einsum("hld,hde->hle", o, w_out_ref[...],
                       preferred_element_type=jnp.float32)  # (H, L, E)
    ctx = jnp.sum(ctx_h, axis=0) + b_out_ref[...]         # (L, E)
    ctx_ref[0] = ctx.astype(ctx_ref.dtype)

    if wts_ref is not None:
        wts_ref[0] = (jnp.sum(p, axis=0) * (1.0 / H)).astype(wts_ref.dtype)


def positional_multihead_attention(x, kparams, attention_mask=None,
                                   use_positional_encoding=True,
                                   return_weights=True):
    """x: (L, N, E) sequence-first.
    Returns (ctx (L, N, E), wts (N, L, L) or None)."""
    L, N, E = x.shape
    H = NUM_HEADS
    d = E // H
    if N > MAX_LEN:
        raise ValueError("batch dim exceeds PE table: the PyTorch module "
                         "indexes the positional encoding by the batch dim")

    if use_positional_encoding:
        # faithful to the quirky PyTorch behaviour: pe row is selected by the
        # *batch* index and broadcast over the sequence dimension.
        x = x + kparams["pe"][:N][None, :, :].astype(x.dtype)
    x_b = jnp.transpose(x, (1, 0, 2))                     # (N, L, E)

    if attention_mask is None:
        bias = jnp.zeros((N, 1, L), jnp.float32)
    else:
        bias = jnp.where(attention_mask > 0, 0.0, NEG_INF)
        bias = bias.astype(jnp.float32).reshape(N, 1, L)

    kernel = functools.partial(_mha_kernel, num_heads=H)

    in_specs = [
        pl.BlockSpec((1, L, E), lambda n: (n, 0, 0)),         # x (per batch)
        pl.BlockSpec((1, 1, L), lambda n: (n, 0, 0)),         # key-padding bias
        pl.BlockSpec((3, H, E, d), lambda n: (0, 0, 0, 0)),   # w_q|k|v packed
        pl.BlockSpec((3, H, 1, d), lambda n: (0, 0, 0, 0)),   # b_q|k|v packed
        pl.BlockSpec((H, d, E), lambda n: (0, 0, 0)),         # w_out packed
        pl.BlockSpec((1, E), lambda n: (0, 0)),               # b_out
    ]
    ctx_shape = jax.ShapeDtypeStruct((N, L, E), x.dtype)
    ctx_spec = pl.BlockSpec((1, L, E), lambda n: (n, 0, 0))

    if return_weights:
        out_shape = (ctx_shape, jax.ShapeDtypeStruct((N, L, L), jnp.float32))
        out_specs = (ctx_spec, pl.BlockSpec((1, L, L), lambda n: (n, 0, 0)))
    else:
        out_shape = ctx_shape
        out_specs = ctx_spec

    outs = pl.pallas_call(
        kernel,
        out_shape=out_shape,
        grid=(N,),
        in_specs=in_specs,
        out_specs=out_specs,
        compiler_params=pltpu.CompilerParams(
            dimension_semantics=("parallel",)),
    )(x_b, bias, kparams["w_qkv_h"], kparams["b_qkv_h"],
      kparams["w_out_h"], kparams["b_out"])

    if return_weights:
        ctx_b, wts = outs
    else:
        ctx_b, wts = outs, None
    ctx = jnp.transpose(ctx_b, (1, 0, 2))                 # back to (L, N, E)
    return ctx, wts


def make_positional_encoding(max_len, d_model, scale):
    position = jnp.arange(max_len, dtype=jnp.float32)[:, None]
    div_term = jnp.exp(
        jnp.arange(0, d_model, 2, dtype=jnp.float32)
        * -(jnp.log(jnp.float32(scale)) / d_model))
    pe = jnp.zeros((max_len, d_model), jnp.float32)
    pe = pe.at[:, 0::2].set(jnp.sin(position * div_term))
    pe = pe.at[:, 1::2].set(jnp.cos(position * div_term))
    return pe


def init_params(key):
    """Raw (PyTorch-layout) parameters of the attention block."""
    k_in, k_bin, k_out, k_bout = jax.random.split(key, 4)
    bound_in = math.sqrt(6.0 / (D_MODEL + D_MODEL))     # xavier-uniform-like
    w_in = jax.random.uniform(k_in, (3 * D_MODEL, D_MODEL), jnp.float32,
                              -bound_in, bound_in)
    b_in = jax.random.uniform(k_bin, (3 * D_MODEL,), jnp.float32, -0.1, 0.1)
    bound_out = 1.0 / math.sqrt(D_MODEL)
    w_out = jax.random.uniform(k_out, (D_MODEL, D_MODEL), jnp.float32,
                               -bound_out, bound_out)
    b_out = jax.random.uniform(k_bout, (D_MODEL,), jnp.float32, -0.1, 0.1)
    return {"pe": make_positional_encoding(MAX_LEN, D_MODEL, SCALE),
            "w_in": w_in, "b_in": b_in, "w_out": w_out, "b_out": b_out}


def pack_params(params):
    """One-time packing: head-major weights, fold 1/sqrt(head_dim) into q."""
    E, H, d = D_MODEL, NUM_HEADS, HEAD_DIM
    scale = 1.0 / math.sqrt(d)

    w_q, w_k, w_v = jnp.split(params["w_in"], 3, axis=0)   # each (E_out, E_in)
    b_q, b_k, b_v = jnp.split(params["b_in"], 3)
    w_q = w_q * scale
    b_q = b_q * scale

    def to_heads_w(w):       # (E_out, E_in) -> (H, E_in, d): w_h[h,e,c] = w[h*d+c, e]
        return jnp.transpose(w.reshape(H, d, E), (0, 2, 1))

    def to_heads_b(b):       # (E,) -> (H, 1, d)
        return b.reshape(H, 1, d)

    w_qkv_h = jnp.stack([to_heads_w(w_q), to_heads_w(w_k), to_heads_w(w_v)],
                        axis=0)                              # (3, H, E, d)
    b_qkv_h = jnp.stack([to_heads_b(b_q), to_heads_b(b_k), to_heads_b(b_v)],
                        axis=0)                              # (3, H, 1, d)

    # out projection: ctx = o_cat @ w_out^T ; head-packed w_out_h[h,c,f] = w_out[f, h*d+c]
    w_out_h = jnp.transpose(params["w_out"]).reshape(H, d, E)

    return {"pe": params["pe"],
            "w_qkv_h": w_qkv_h, "b_qkv_h": b_qkv_h,
            "w_out_h": w_out_h, "b_out": params["b_out"].reshape(1, E)}


def reference_forward(x, params, attention_mask=None, use_positional_encoding=True):
    """Pure-JAX reference using the untouched (PyTorch-layout) parameters."""
    L, N, E = x.shape
    H, d = NUM_HEADS, HEAD_DIM
    if use_positional_encoding:
        x = x + params["pe"][:N][None, :, :]
    xt = jnp.transpose(x, (1, 0, 2))                                   # (N, L, E)
    qkv = jnp.einsum("nle,fe->nlf", xt, params["w_in"],
                     precision="highest") + params["b_in"]
    q, k, v = jnp.split(qkv, 3, axis=-1)
    q = q * (1.0 / math.sqrt(d))
    q = q.reshape(N, L, H, d).transpose(0, 2, 1, 3)
    k = k.reshape(N, L, H, d).transpose(0, 2, 1, 3)
    v = v.reshape(N, L, H, d).transpose(0, 2, 1, 3)
    s = jnp.einsum("nhld,nhmd->nhlm", q, k, precision="highest")
    if attention_mask is not None:
        s = s + jnp.where(attention_mask > 0, 0.0, NEG_INF)[:, None, None, :]
    p = jax.nn.softmax(s, axis=-1)
    o = jnp.einsum("nhlm,nhmd->nhld", p, v, precision="highest")
    o = o.transpose(0, 2, 1, 3).reshape(N, L, E)
    ctx = jnp.einsum("nle,fe->nlf", o, params["w_out"],
                     precision="highest") + params["b_out"]
    return jnp.transpose(ctx, (1, 0, 2)), jnp.mean(p, axis=1)


if __name__ == "__main__":
    key = jax.random.PRNGKey(0)
    kx, kp = jax.random.split(key)
    x = jax.random.normal(kx, (SEQ_LEN, BATCH, D_MODEL), jnp.float32)
    params = init_params(kp)
    kparams = pack_params(params)        # head-major packing + fold q-scaling

    attention_mask = jnp.ones((BATCH, SEQ_LEN), jnp.int32)
    attention_mask = attention_mask.at[1, SEQ_LEN - 2:].set(0)  # pad 2 keys, batch 1

    ctx, wts = positional_multihead_attention(
        x, kparams, attention_mask=attention_mask,
        use_positional_encoding=True, return_weights=True)
    jax.block_until_ready((ctx, wts))

    assert ctx.shape == (SEQ_LEN, BATCH, D_MODEL)
    assert wts.shape == (BATCH, SEQ_LEN, SEQ_LEN)

    # sanity: softmax rows sum to ~1 and padded keys get ~zero weight
    row_sums = jnp.sum(wts, axis=-1)
    assert jnp.allclose(row_sums, jnp.ones_like(row_sums), atol=1e-3)
    assert float(jnp.max(jnp.abs(wts[1, :, SEQ_LEN - 2:]))) < 1e-6

    # compare against a pure-JAX reference built from the raw parameters
    ctx_ref, wts_ref = reference_forward(x, params, attention_mask, True)
    assert jnp.allclose(ctx, ctx_ref, atol=2e-2, rtol=2e-2), \
        float(jnp.max(jnp.abs(ctx - ctx_ref)))
    assert jnp.allclose(wts, wts_ref, atol=2e-2, rtol=2e-2), \
        float(jnp.max(jnp.abs(wts - wts_ref)))

    # fast path: embeddings only (no attention-map output allocated/stored)
    ctx_fast, wts_none = positional_multihead_attention(
        x, kparams, attention_mask=attention_mask,
        use_positional_encoding=True, return_weights=False)
    jax.block_until_ready(ctx_fast)
    assert wts_none is None
    assert jnp.allclose(ctx_fast, ctx, atol=1e-5, rtol=1e-5)

    print("KERNEL_OK")
</pallas_src>

<mosaic_0001>
module attributes {stable_mosaic.version = 11 : i64} {
  func.func @_mha_kernel(%arg0: i32, %arg1: memref<1x8x32xf32, #tpu.memory_space<vmem>>, %arg2: memref<1x1x8xf32, #tpu.memory_space<vmem>>, %arg3: memref<3x4x32x8xf32, #tpu.memory_space<vmem>>, %arg4: memref<3x4x1x8xf32, #tpu.memory_space<vmem>>, %arg5: memref<4x8x32xf32, #tpu.memory_space<vmem>>, %arg6: memref<1x32xf32, #tpu.memory_space<vmem>>, %arg7: memref<1x8x32xf32, #tpu.memory_space<vmem>>, %arg8: memref<1x8x8xf32, #tpu.memory_space<vmem>>) attributes {dimension_semantics = [#tpu.dimension_semantics<parallel>], iteration_bounds = array<i64: 2>, scalar_prefetch = 0 : i64, scratch_operands = 0 : i64, tpu.core_type = #tpu.core_type<tc>, window_params = [{transform_indices = @transform_0, window_bounds = array<i64: 1, 8, 32>}, {transform_indices = @transform_1, window_bounds = array<i64: 1, 1, 8>}, {pipeline_mode = #tpu.pipeline_mode<synchronous>, transform_indices = @transform_2, window_bounds = array<i64: 3, 4, 32, 8>}, {pipeline_mode = #tpu.pipeline_mode<synchronous>, transform_indices = @transform_3, window_bounds = array<i64: 3, 4, 1, 8>}, {pipeline_mode = #tpu.pipeline_mode<synchronous>, transform_indices = @transform_4, window_bounds = array<i64: 4, 8, 32>}, {pipeline_mode = #tpu.pipeline_mode<synchronous>, transform_indices = @transform_5, window_bounds = array<i64: 1, 32>}, {transform_indices = @transform_6, window_bounds = array<i64: 1, 8, 32>}, {transform_indices = @transform_7, window_bounds = array<i64: 1, 8, 8>}]} {
    %c0 = arith.constant 0 : index
    %c0_0 = arith.constant 0 : index
    %c0_1 = arith.constant 0 : index
    %0 = vector.load %arg1[%c0, %c0_0, %c0_1] : memref<1x8x32xf32, #tpu.memory_space<vmem>>, vector<1x8x32xf32>
    %1 = vector.shape_cast %0 : vector<1x8x32xf32> to vector<8x32xf32>
    %2 = vector.shape_cast %1 : vector<8x32xf32> to vector<1x8x32xf32>
    %3 = vector.shape_cast %2 : vector<1x8x32xf32> to vector<1x8x32xf32>
    %4 = vector.broadcast %3 : vector<1x8x32xf32> to vector<4x8x32xf32>
    %c0_2 = arith.constant 0 : index
    %c0_3 = arith.constant 0 : index
    %c0_4 = arith.constant 0 : index
    %c0_5 = arith.constant 0 : index
    %5 = vector.load %arg3[%c0_2, %c0_3, %c0_4, %c0_5] : memref<3x4x32x8xf32, #tpu.memory_space<vmem>>, vector<1x4x32x8xf32>
    %6 = vector.shape_cast %5 : vector<1x4x32x8xf32> to vector<4x32x8xf32>
    "tpu.trace_start"() <{level = 10 : i32, message = "hle,hed->hld"}> : () -> ()
    %cst = arith.constant dense<0.000000e+00> : vector<4x8x8xf32>
    %7 = tpu.matmul %4, %6, %cst {dimension_numbers = #tpu.dot_dimension_numbers<[2], [1], [1], [2], [0, 0, 0, 1, 1, 2], [0], [0]>} : vector<4x8x32xf32>, vector<4x32x8xf32>, vector<4x8x8xf32> -> vector<4x8x8xf32>
    "tpu.trace_stop"() : () -> ()
    %c0_6 = arith.constant 0 : index
    %c0_7 = arith.constant 0 : index
    %c0_8 = arith.constant 0 : index
    %c0_9 = arith.constant 0 : index
    %8 = vector.load %arg4[%c0_6, %c0_7, %c0_8, %c0_9] : memref<3x4x1x8xf32, #tpu.memory_space<vmem>>, vector<1x4x1x8xf32>
    %9 = vector.shape_cast %8 : vector<1x4x1x8xf32> to vector<4x1x8xf32>
    %10 = vector.broadcast %9 : vector<4x1x8xf32> to vector<4x8x8xf32>
    %11 = arith.addf %7, %10 : vector<4x8x8xf32>
    %c1 = arith.constant 1 : index
    %c0_10 = arith.constant 0 : index
    %c0_11 = arith.constant 0 : index
    %c0_12 = arith.constant 0 : index
    %12 = vector.load %arg3[%c1, %c0_10, %c0_11, %c0_12] : memref<3x4x32x8xf32, #tpu.memory_space<vmem>>, vector<1x4x32x8xf32>
    %13 = vector.shape_cast %12 : vector<1x4x32x8xf32> to vector<4x32x8xf32>
    "tpu.trace_start"() <{level = 10 : i32, message = "hle,hed->hld"}> : () -> ()
    %cst_13 = arith.constant dense<0.000000e+00> : vector<4x8x8xf32>
    %14 = tpu.matmul %4, %13, %cst_13 {dimension_numbers = #tpu.dot_dimension_numbers<[2], [1], [1], [2], [0, 0, 0, 1, 1, 2], [0], [0]>} : vector<4x8x32xf32>, vector<4x32x8xf32>, vector<4x8x8xf32> -> vector<4x8x8xf32>
    "tpu.trace_stop"() : () -> ()
    %c1_14 = arith.constant 1 : index
    %c0_15 = arith.constant 0 : index
    %c0_16 = arith.constant 0 : index
    %c0_17 = arith.constant 0 : index
    %15 = vector.load %arg4[%c1_14, %c0_15, %c0_16, %c0_17] : memref<3x4x1x8xf32, #tpu.memory_space<vmem>>, vector<1x4x1x8xf32>
    %16 = vector.shape_cast %15 : vector<1x4x1x8xf32> to vector<4x1x8xf32>
    %17 = vector.broadcast %16 : vector<4x1x8xf32> to vector<4x8x8xf32>
    %18 = arith.addf %14, %17 : vector<4x8x8xf32>
    %c2 = arith.constant 2 : index
    %c0_18 = arith.constant 0 : index
    %c0_19 = arith.constant 0 : index
    %c0_20 = arith.constant 0 : index
    %19 = vector.load %arg3[%c2, %c0_18, %c0_19, %c0_20] : memref<3x4x32x8xf32, #tpu.memory_space<vmem>>, vector<1x4x32x8xf32>
    %20 = vector.shape_cast %19 : vector<1x4x32x8xf32> to vector<4x32x8xf32>
    "tpu.trace_start"() <{level = 10 : i32, message = "hle,hed->hld"}> : () -> ()
    %cst_21 = arith.constant dense<0.000000e+00> : vector<4x8x8xf32>
    %21 = tpu.matmul %4, %20, %cst_21 {dimension_numbers = #tpu.dot_dimension_numbers<[2], [1], [1], [2], [0, 0, 0, 1, 1, 2], [0], [0]>} : vector<4x8x32xf32>, vector<4x32x8xf32>, vector<4x8x8xf32> -> vector<4x8x8xf32>
    "tpu.trace_stop"() : () -> ()
    %c2_22 = arith.constant 2 : index
    %c0_23 = arith.constant 0 : index
    %c0_24 = arith.constant 0 : index
    %c0_25 = arith.constant 0 : index
    %22 = vector.load %arg4[%c2_22, %c0_23, %c0_24, %c0_25] : memref<3x4x1x8xf32, #tpu.memory_space<vmem>>, vector<1x4x1x8xf32>
    %23 = vector.shape_cast %22 : vector<1x4x1x8xf32> to vector<4x1x8xf32>
    %24 = vector.broadcast %23 : vector<4x1x8xf32> to vector<4x8x8xf32>
    %25 = arith.addf %21, %24 : vector<4x8x8xf32>
    "tpu.trace_start"() <{level = 10 : i32, message = "hld,hmd->hlm"}> : () -> ()
    %cst_26 = arith.constant dense<0.000000e+00> : vector<4x8x8xf32>
    %26 = tpu.matmul %11, %18, %cst_26 {dimension_numbers = #tpu.dot_dimension_numbers<[2], [2], [1], [1], [0, 0, 0, 1, 1, 1], [0], [0]>} : vector<4x8x8xf32>, vector<4x8x8xf32>, vector<4x8x8xf32> -> vector<4x8x8xf32>
    "tpu.trace_stop"() : () -> ()
    %c0_27 = arith.constant 0 : index
    %c0_28 = arith.constant 0 : index
    %c0_29 = arith.constant 0 : index
    %27 = vector.load %arg2[%c0_27, %c0_28, %c0_29] : memref<1x1x8xf32, #tpu.memory_space<vmem>>, vector<1x1x8xf32>
    %28 = vector.broadcast %27 : vector<1x1x8xf32> to vector<4x8x8xf32>
    %29 = arith.addf %26, %28 : vector<4x8x8xf32>
    %cst_30 = arith.constant dense<0xFF800000> : vector<4x8xf32>
    %30 = vector.multi_reduction <maximumf>, %29, %cst_30 [2] : vector<4x8x8xf32> to vector<4x8xf32>
    %31 = vector.shape_cast %30 : vector<4x8xf32> to vector<4x8x1xf32>
    %32 = vector.broadcast %31 : vector<4x8x1xf32> to vector<4x8x8xf32>
    %33 = arith.subf %29, %32 : vector<4x8x8xf32>
    %34 = math.exp %33 : vector<4x8x8xf32>
    %cst_31 = arith.constant dense<0.000000e+00> : vector<4x8xf32>
    %35 = vector.multi_reduction <add>, %34, %cst_31 [2] : vector<4x8x8xf32> to vector<4x8xf32>
    %36 = vector.shape_cast %35 : vector<4x8xf32> to vector<4x8x1xf32>
    %37 = tpu.reciprocal %36 : vector<4x8x1xf32> -> vector<4x8x1xf32>
    %38 = vector.broadcast %37 : vector<4x8x1xf32> to vector<4x8x8xf32>
    %39 = arith.mulf %34, %38 : vector<4x8x8xf32>
    "tpu.trace_start"() <{level = 10 : i32, message = "hlm,hmd->hld"}> : () -> ()
    %cst_32 = arith.constant dense<0.000000e+00> : vector<4x8x8xf32>
    %40 = tpu.matmul %39, %25, %cst_32 {dimension_numbers = #tpu.dot_dimension_numbers<[2], [1], [1], [2], [0, 0, 0, 1, 1, 2], [0], [0]>} : vector<4x8x8xf32>, vector<4x8x8xf32>, vector<4x8x8xf32> -> vector<4x8x8xf32>
    "tpu.trace_stop"() : () -> ()
    %c0_33 = arith.constant 0 : index
    %c0_34 = arith.constant 0 : index
    %c0_35 = arith.constant 0 : index
    %41 = vector.load %arg5[%c0_33, %c0_34, %c0_35] : memref<4x8x32xf32, #tpu.memory_space<vmem>>, vector<4x8x32xf32>
    "tpu.trace_start"() <{level = 10 : i32, message = "hld,hde->hle"}> : () -> ()
    %cst_36 = arith.constant dense<0.000000e+00> : vector<4x8x32xf32>
    %42 = tpu.matmul %40, %41, %cst_36 {dimension_numbers = #tpu.dot_dimension_numbers<[2], [1], [1], [2], [0, 0, 0, 1, 1, 2], [0], [0]>} : vector<4x8x8xf32>, vector<4x8x32xf32>, vector<4x8x32xf32> -> vector<4x8x32xf32>
    "tpu.trace_stop"() : () -> ()
    %cst_37 = arith.constant dense<0.000000e+00> : vector<8x32xf32>
    %43 = vector.multi_reduction <add>, %42, %cst_37 [0] : vector<4x8x32xf32> to vector<8x32xf32>
    %c0_38 = arith.constant 0 : index
    %c0_39 = arith.constant 0 : index
    %44 = vector.load %arg6[%c0_38, %c0_39] : memref<1x32xf32, #tpu.memory_space<vmem>>, vector<1x32xf32>
    %45 = vector.broadcast %44 : vector<1x32xf32> to vector<8x32xf32>
    %46 = arith.addf %43, %45 : vector<8x32xf32>
    %c0_40 = arith.constant 0 : index
    %c0_41 = arith.constant 0 : index
    %c0_42 = arith.constant 0 : index
    %47 = vector.load %arg7[%c0_40, %c0_41, %c0_42] : memref<1x8x32xf32, #tpu.memory_space<vmem>>, vector<1x8x32xf32>
    %48 = vector.shape_cast %47 : vector<1x8x32xf32> to vector<8x32xf32>
    %49 = vector.shape_cast %46 : vector<8x32xf32> to vector<1x8x32xf32>
    tpu.vector_store %arg7[%c0_40, %c0_41, %c0_42], %49 {strides = array<i32>} : memref<1x8x32xf32, #tpu.memory_space<vmem>>, vector<1x8x32xf32>,
    %cst_43 = arith.constant dense<0.000000e+00> : vector<8x8xf32>
    %50 = vector.multi_reduction <add>, %39, %cst_43 [0] : vector<4x8x8xf32> to vector<8x8xf32>
    %cst_44 = arith.constant 2.500000e-01 : f32
    %51 = vector.broadcast %cst_44 : f32 to vector<8x8xf32>
    %52 = arith.mulf %50, %51 : vector<8x8xf32>
    %c0_45 = arith.constant 0 : index
    %c0_46 = arith.constant 0 : index
    %c0_47 = arith.constant 0 : index
    %53 = vector.load %arg8[%c0_45, %c0_46, %c0_47] : memref<1x8x8xf32, #tpu.memory_space<vmem>>, vector<1x8x8xf32>
    %54 = vector.shape_cast %53 : vector<1x8x8xf32> to vector<8x8xf32>
    %55 = vector.shape_cast %52 : vector<8x8xf32> to vector<1x8x8xf32>
    tpu.vector_store %arg8[%c0_45, %c0_46, %c0_47], %55 {strides = array<i32>} : memref<1x8x8xf32, #tpu.memory_space<vmem>>, vector<1x8x8xf32>,
    return
  }
  func.func @transform_0(%arg0: i32) -> (i32, i32, i32) {
    %c0_i32 = arith.constant 0 : i32
    %c0_i32_0 = arith.constant 0 : i32
    %c0_i32_1 = arith.constant 0 : i32
    return %arg0, %c0_i32, %c0_i32_0 : i32, i32, i32
  }
  func.func @transform_1(%arg0: i32) -> (i32, i32, i32) {
    %c0_i32 = arith.constant 0 : i32
    %c0_i32_0 = arith.constant 0 : i32
    %c0_i32_1 = arith.constant 0 : i32
    return %arg0, %c0_i32, %c0_i32_0 : i32, i32, i32
  }
  func.func @transform_2(%arg0: i32) -> (i32, i32, i32, i32) {
    %c0_i32 = arith.constant 0 : i32
    %c0_i32_0 = arith.constant 0 : i32
    %c0_i32_1 = arith.constant 0 : i32
    %c0_i32_2 = arith.constant 0 : i32
    %c0_i32_3 = arith.constant 0 : i32
    return %c0_i32, %c0_i32_0, %c0_i32_1, %c0_i32_2 : i32, i32, i32, i32
  }
  func.func @transform_3(%arg0: i32) -> (i32, i32, i32, i32) {
    %c0_i32 = arith.constant 0 : i32
    %c0_i32_0 = arith.constant 0 : i32
    %c0_i32_1 = arith.constant 0 : i32
    %c0_i32_2 = arith.constant 0 : i32
    %c0_i32_3 = arith.constant 0 : i32
    return %c0_i32, %c0_i32_0, %c0_i32_1, %c0_i32_2 : i32, i32, i32, i32
  }
  func.func @transform_4(%arg0: i32) -> (i32, i32, i32) {
    %c0_i32 = arith.constant 0 : i32
    %c0_i32_0 = arith.constant 0 : i32
    %c0_i32_1 = arith.constant 0 : i32
    %c0_i32_2 = arith.constant 0 : i32
    return %c0_i32, %c0_i32_0, %c0_i32_1 : i32, i32, i32
  }
  func.func @transform_5(%arg0: i32) -> (i32, i32) {
    %c0_i32 = arith.constant 0 : i32
    %c0_i32_0 = arith.constant 0 : i32
    %c0_i32_1 = arith.constant 0 : i32
    return %c0_i32, %c0_i32_0 : i32, i32
  }
  func.func @transform_6(%arg0: i32) -> (i32, i32, i32) {
    %c0_i32 = arith.constant 0 : i32
    %c0_i32_0 = arith.constant 0 : i32
    %c0_i32_1 = arith.constant 0 : i32
    return %arg0, %c0_i32, %c0_i32_0 : i32, i32, i32
  }
  func.func @transform_7(%arg0: i32) -> (i32, i32, i32) {
    %c0_i32 = arith.constant 0 : i32
    %c0_i32_0 = arith.constant 0 : i32
    %c0_i32_1 = arith.constant 0 : i32
    return %arg0, %c0_i32, %c0_i32_0 : i32, i32, i32
  }
}

</mosaic_0001>

<bundles_post_ra>
// kernel: tpu_custom_call.1
= control target key start
LH: loop header
LB: loop body
LE: loop exit
PB: predicated region body
PF: predicated region fallthrough
CT: control target
= control target key end

     0   :  { %13 = vsyncpa [#allocation3], 0  ;;  %s3519_s0 = inlined_call_operand.vmem [shape: f32[2,8,32], index: 0, kind: input, shape index: {}]   ;;  %s3520_s1 = inlined_call_operand.vmem [shape: f32[2,1,8], index: 1, kind: input, shape index: {}]   ;;  %s3521_s2 = inlined_call_operand.vmem [shape: f32[3,4,32,8], index: 2, kind: input, shape index: {}]   ;;  %s3522_s3 = inlined_call_operand.vmem [shape: f32[3,4,1,8], index: 3, kind: input, shape index: {}]   ;;  %s3523_s4 = inlined_call_operand.vmem [shape: f32[4,8,32], index: 4, kind: input, shape index: {}]   ;;  %s3524_s5 = inlined_call_operand.vmem [shape: f32[1,32], index: 5, kind: input, shape index: {}]   ;;  %s3525_s6 = inlined_call_operand.hbm [shape: f32[2,8,32], index: 6, kind: output, shape index: {0}]   ;;  %s3526_s7 = inlined_call_operand.hbm [shape: f32[2,8,8], index: 7, kind: output, shape index: {1}]  }
   0x1   :  { %15 = vsyncpa [#allocation3 + $0x1], 0 }
   0x2   :  { %16 = vsyncpa [#allocation5], 0 }
   0x3   :  { %18 = vsyncpa [#allocation5 + $0x1], 0  ;;  %s3028_s24 = smov 0   ;;  %s3030_s25 = smov 0  }
   0x4   :  { %s3032_s26 = smov 0   ;;  %s3034_s27 = smov 0  }
   0x5 LB: > { %s3049_s28 = sadd.s32 4294967295, %s2981_s27   ;;  %s2381_s29 = sadd.s32 4294967294, %s2981_s27   ;;  %s2981_s27 = sphi %s3034_s27, %s3532_s27   ;;  %s2977_s26 = sphi %s3032_s26, %s3531_s26   ;;  %s2973_s25 = sphi %s3030_s25, %s3530_s25   ;;  %s2969_s24 = sphi %s3028_s24, %s3529_s24  }
   0x6   : > { %s3053_s30 = sadd.s32 1, %s2981_s27   ;;  %s167_s8 = sadd.s32 1, %s2977_s26 }
   0x7   : > { %s164_s9 = ssub.s32 %s2981_s27, %s3053_s30  ;;  %p177_p0 = scmp.ne.s32.totalorder %s2977_s26, %s2973_s25 }
   0x8   : > { %p165_p1 = scmp.eq.s32.totalorder %s164_s9, 0  ;;  %p178_p2 = scmp.eq.s32.totalorder %s3049_s28, 1 }
   0x9   : > { %p183_p3 = scmp.ne.s32.totalorder %s2973_s25, %s2969_s24  ;;  %p184_p4 = scmp.eq.s32.totalorder %s2381_s29, 1 }
   0xa   : > { %s3064_s10 = scalar_select %p165_p1, %s2977_s26, %s167_s8  }
   0xb   : > { %p3066_p5 = por %p178_p2, %p177_p0  ;;  %p3070_p6 = por %p184_p4, %p183_p3 }
   0xc   : > { %p2384_p7 = scmp.ge.s32.totalorder %s2981_s27, 1  ;;  %p253_p8 = scmp.lt.s32.totalorder %s2981_s27, 3 }
   0xe   : > { %p254_p9 = pnand %p2384_p7, %p253_p8 }
   0xf   : > { %v300_v0 = vld [vmem:[%s3521_s2] sm:$0xff] (!%p254_p9)  ;;  %v301_v1 = vld [vmem:[%s3521_s2 + $0x8] sm:$0xff] (!%p254_p9)  ;;  %v2983_v3 = vmov (!%p254_p9), 0.0|0.0   ;;  %v302_v6 = vld [vmem:[%s3521_s2 + $0x10] sm:$0xff] (!%p254_p9)  ;;  %p292_p10 = scmp.lt.s32.totalorder (!%p254_p9), %s3049_s28, 1  ;;  %vm2984_vm0 = vmmov (!%p254_p9), 0  }
  0x10   : > { %257 = sbr.rel (%p254_p9) target bundleno = 1244 (0x4dc), region = 44  ;;  %v304_v2 = vld [vmem:[%s3521_s2 + $0x20] sm:$0xff] (!%p254_p9)  ;;  %2752 = vmatprep.subr.bf16.mxu0 (!%p254_p9), %v2983_v3  ;;  %2758 = vmatprep.subr.bf16.mxu1 (!%p254_p9), %v2983_v3  ;;  %v2753_v4 = vpack.c.bf16 (!%p254_p9), %v301_v1, %v300_v0  ;;  %v305_v5 = vld [vmem:[%s3521_s2 + $0x28] sm:$0xff] (!%p254_p9)  ;;  %v303_v7 = vld [vmem:[%s3521_s2 + $0x18] sm:$0xff] (!%p254_p9)  ;;  %v2985_v11 = vmov (!%p254_p9), 0.0   ;;  %vm344_vm1 = vcmask (!%p254_p9), 261120  }
  0x11   : > { %v2759_v8 = vpack.c.bf16 (!%p254_p9), %v305_v5, %v304_v2  ;;  %v306_v9 = vld [vmem:[%s3521_s2 + $0x30] sm:$0xff] (!%p254_p9)  ;;  %v307_v10 = vld [vmem:[%s3521_s2 + $0x38] sm:$0xff] (!%p254_p9)  ;;  %2568 = vmatprep.mubr.msk.f32.mxu0 (!%p254_p9), %vm2984_vm0, %v2985_v11  ;;  %2579 = vmatprep.mubr.msk.f32.mxu1 (!%p254_p9), %vm2984_vm0, %v2985_v11  ;;  %v2756_v12 = vpack.c.bf16 (!%p254_p9), %v303_v7, %v302_v6  ;;  %v308_v14 = vld [vmem:[%s3521_s2 + $0x40] sm:$0xff] (!%p254_p9)  ;;  %vm1287_vm2 = vcmask (!%p254_p9), 64512   ;;  %s3395_s22 = sand.u32 (!%p254_p9), 1, %s2973_s25   ;;  %s2472_s19 = sshll.u32 (!%p254_p9), %s3049_s28, 7 }
  0x12   : > { %2754 = vmatpush3.bf16.msra.mxu0 (!%p254_p9), %v2753_v4  ;;  %v2762_v13 = vpack.c.bf16 (!%p254_p9), %v307_v10, %v306_v9  ;;  %v309_v15 = vld [vmem:[%s3521_s2 + $0x48] sm:$0xff] (!%p254_p9)  ;;  %v312_v16 = vld [vmem:[%s3521_s2 + $0x60] sm:$0xff] (!%p254_p9)  ;;  %v310_v21 = vld [vmem:[%s3521_s2 + $0x50] sm:$0xff] (!%p254_p9)  ;;  %s2385_s23 = sshll.u32 (!%p254_p9), %s3395_s22, 3  ;;  %s3440_s8 = scalar_lea.hbm (!%p254_p9), %s3526_s7, %s2472_s19 }
  0x13   : > { %2760 = vmatpush3.bf16.msra.mxu1 (!%p254_p9), %v2759_v8  ;;  %2755 = vmatprep.subr.bf16.mxu0 (!%p254_p9), %v2983_v3  ;;  %v313_v17 = vld [vmem:[%s3521_s2 + $0x68] sm:$0xff] (!%p254_p9)  ;;  %v2765_v19 = vpack.c.bf16 (!%p254_p9), %v309_v15, %v308_v14  ;;  %v311_v22 = vld [vmem:[%s3521_s2 + $0x58] sm:$0xff] (!%p254_p9)  ;;  %v314_v23 = vld [vmem:[%s3521_s2 + $0x70] sm:$0xff] (!%p254_p9)  ;;  %s3408_s29 = scalar_lea.vmem (!%p254_p9), [#allocation4], %s2385_s23  ;;  %s2986_s16 = smov (!%p254_p9), [#allocation4]  }
  0x14   : > { %2761 = vmatprep.subr.bf16.mxu1 (!%p254_p9), %v2983_v3  ;;  %v2771_v20 = vpack.c.bf16 (!%p254_p9), %v313_v17, %v312_v16  ;;  %v315_v24 = vld [vmem:[%s3521_s2 + $0x78] sm:$0xff] (!%p254_p9)  ;;  %v2768_v25 = vpack.c.bf16 (!%p254_p9), %v311_v22, %v310_v21  ;;  %v2396_v27 = vld [vmem:[%s3521_s2 + $0x80] sm:$0xff] (!%p254_p9)  ;;  %v2397_v28 = vld [vmem:[%s3521_s2 + $0x88] sm:$0xff] (!%p254_p9)  ;;  %s2281_s9 = sshll.u32 (!%p254_p9), %s3408_s29, 4  ;;  %s2891_s17 = sshll.u32 (!%p254_p9), %s2986_s16, 4  ;;  %s2282_s9 = int_to_ptr.vmem [resolvable:$true] %s2281_s9  ;;  %s2892_s17 = int_to_ptr.vmem [resolvable:$false] %s2891_s17 }
  0x15   : > { %v2774_v26 = vpack.c.bf16 (!%p254_p9), %v315_v24, %v314_v23  ;;  %v2400_v29 = vld [vmem:[%s3521_s2 + $0xa0] sm:$0xff] (!%p254_p9)  ;;  %v2401_v30 = vld [vmem:[%s3521_s2 + $0xa8] sm:$0xff] (!%p254_p9)  ;;  %v2777_v31 = vpack.c.bf16 (!%p254_p9), %v2397_v28, %v2396_v27  ;;  %v2398_v33 = vld [vmem:[%s3521_s2 + $0x90] sm:$0xff] (!%p254_p9)  ;;  %s2887_s14 = scalar_lea.vmem (!%p254_p9), %s2282_s9, 128  ;;  %p2894_p0 = scmp.lt.s32.totalorder (!%p254_p9), %s2282_s9, %s2892_s17 }
  0x16   : > { %2757 = vmatpush3.bf16.msra.mxu0 (!%p254_p9), %v2756_v12  ;;  %v2783_v32 = vpack.c.bf16 (!%p254_p9), %v2401_v30, %v2400_v29  ;;  %v2399_v34 = vld [vmem:[%s3521_s2 + $0x98] sm:$0xff] (!%p254_p9)  ;;  %v2402_v35 = vld [vmem:[%s3521_s2 + $0xb0] sm:$0xff] (!%p254_p9)  ;;  %v2404_v39 = vld [vmem:[%s3521_s2 + $0xc0] sm:$0xff] (!%p254_p9)  ;;  %p2888_p11 = scmp.ne.s32.totalorder (!%p254_p9), %s2282_s9, %s2887_s14 }
  0x17   : > { %s3108_s15 = scalar_select %p292_p10, %s3049_s28, 1  ;;  %2763 = vmatpush3.bf16.msra.mxu1 %v2762_v13  ;;  %2764 = vmatprep.subr.bf16.mxu0 %v2983_v3  ;;  %v2403_v36 = vld [vmem:[%s3521_s2 + $0xb8] sm:$0xff]  ;;  %v2780_v37 = vpack.c.bf16 %v2399_v34, %v2398_v33  ;;  %v2405_v40 = vld [vmem:[%s3521_s2 + $0xc8] sm:$0xff]  ;;  %v2408_v41 = vld [vmem:[%s3521_s2 + $0xe0] sm:$0xff] }
  0x18   : > { %2770 = vmatprep.subr.bf16.mxu1 %v2983_v3  ;;  %v2786_v38 = vpack.c.bf16 %v2403_v36, %v2402_v35  ;;  %v2409_v42 = vld [vmem:[%s3521_s2 + $0xe8] sm:$0xff]  ;;  %v2789_v43 = vpack.c.bf16 %v2405_v40, %v2404_v39  ;;  %v2406_v45 = vld [vmem:[%s3521_s2 + $0xd0] sm:$0xff]  ;;  %v2407_v46 = vld [vmem:[%s3521_s2 + $0xd8] sm:$0xff]  ;;  %p2889_p12 = pnand %p2888_p11, %p3066_p5 }
  0x19   : > { %s2387_s20 = sshll.u32 %s3108_s15, 3  ;;  %v2795_v44 = vpack.c.bf16 %v2409_v42, %v2408_v41  ;;  %v2410_v47 = vld [vmem:[%s3521_s2 + $0xf0] sm:$0xff]  ;;  %v2411_v48 = vld [vmem:[%s3521_s2 + $0xf8] sm:$0xff]  ;;  %v2792_v49 = vpack.c.bf16 %v2407_v46, %v2406_v45  ;;  %v2424_v51 = vld [vmem:[%s3521_s2 + $0x100] sm:$0xff]  ;;  %s298_s18 = scalar_lea.vmem %s3520_s1, %s3108_s15 }
  0x1a   : > { %s295_s13 = scalar_lea.vmem %s3519_s0, %s2387_s20  ;;  %v2798_v50 = vpack.c.bf16 %v2411_v48, %v2410_v47  ;;  %v2425_v52 = vld [vmem:[%s3521_s2 + $0x108] sm:$0xff]  ;;  %v2428_v53 = vld [vmem:[%s3521_s2 + $0x120] sm:$0xff]  ;;  %v2426_v57 = vld [vmem:[%s3521_s2 + $0x110] sm:$0xff]  ;;  %p2890_p13 = pneg %p2889_p12 }
  0x1b   : > { %v3128_v18 = vld [vmem:[%s295_s13] sm:$0xff]  ;;  %v2429_v54 = vld [vmem:[%s3521_s2 + $0x128] sm:$0xff]  ;;  %v2801_v55 = vpack.c.bf16 %v2425_v52, %v2424_v51  ;;  %v2427_v58 = vld [vmem:[%s3521_s2 + $0x118] sm:$0xff]  ;;  %s2255_s13 = scalar_lea.sflag [#allocation5], %s3395_s22 }
  0x1c   : > { %2569 = vmatmul.mubr.msk.f32.vlgmr.msra.gmra.mrb[0].mxu0 %vm344_vm1, %v3128_v18  ;;  %2580 = vmatmul.mubr.msk.f32.vlgmr.msra.gmra.mrb[0].mxu1 %vm344_vm1, %v3128_v18  ;;  %v2807_v56 = vpack.c.bf16 %v2429_v54, %v2428_v53  ;;  %v2430_v59 = vld [vmem:[%s3521_s2 + $0x130] sm:$0xff]  ;;  %v2804_v60 = vpack.c.bf16 %v2427_v58, %v2426_v57  ;;  %v2431_v61 = vld [vmem:[%s3521_s2 + $0x138] sm:$0xff]  ;;  %v2432_v63 = vld [vmem:[%s3521_s2 + $0x140] sm:$0xff] }
  0x1d   : > { %2766 = vmatpush3.bf16.msra.mxu0 %v2765_v19  ;;  %2772 = vmatpush3.bf16.msra.mxu1 %v2771_v20  ;;  %v2810_v62 = vpack.c.bf16 %v2431_v61, %v2430_v59  ;;  %v2433_v0 = vld [vmem:[%s3521_s2 + $0x148] sm:$0xff]  ;;  %v2436_v1 = vld [vmem:[%s3521_s2 + $0x160] sm:$0xff]  ;;  %v2434_v6 = vld [vmem:[%s3521_s2 + $0x150] sm:$0xff] }
  0x1e   : > { %2767 = vmatprep.subr.bf16.mxu0 %v2983_v3  ;;  %2773 = vmatprep.subr.bf16.mxu1 %v2983_v3  ;;  %v2813_v2 = vpack.c.bf16 %v2433_v0, %v2432_v63  ;;  %v2437_v4 = vld [vmem:[%s3521_s2 + $0x168] sm:$0xff]  ;;  %v2435_v7 = vld [vmem:[%s3521_s2 + $0x158] sm:$0xff]  ;;  %v2438_v8 = vld [vmem:[%s3521_s2 + $0x170] sm:$0xff] }
  0x1f   : > { %2590 = vmatprep.mubr.msk.f32.mxu0 %vm2984_vm0, %v2985_v11  ;;  %2601 = vmatprep.mubr.msk.f32.mxu1 %vm2984_vm0, %v2985_v11  ;;  %v2819_v5 = vpack.c.bf16 %v2437_v4, %v2436_v1  ;;  %v2816_v9 = vpack.c.bf16 %v2435_v7, %v2434_v6  ;;  %v2439_v10 = vld [vmem:[%s3521_s2 + $0x178] sm:$0xff]  ;;  %v2416_v21 = vld [vmem:[%s3522_s3 + $0x4] ss:$0 sm:$0xff]  ;;  %v2388_v23 = vld [vmem:[%s3522_s3] ss:$0 sm:$0xff] }
  0x20   : > { %v2822_v12 = vpack.c.bf16 %v2439_v10, %v2438_v8  ;;  %v2389_v27 = vld [vmem:[%s3522_s3 + $0x1] ss:$0 sm:$0xff]  ;;  %v2419_v33 = vld [vmem:[%s3522_s3 + $0x7] ss:$0 sm:$0xff]  ;;  %v2390_v35 = vld [vmem:[%s3522_s3 + $0x2] ss:$0 sm:$0xff] }
  0x21   : > { %2769 = vmatpush3.bf16.msra.mxu0 %v2768_v25  ;;  %2775 = vmatpush3.bf16.msra.mxu1 %v2774_v26  ;;  %v2391_v39 = vld [vmem:[%s3522_s3 + $0x3] ss:$0 sm:$0xff]  ;;  %v2445_v45 = vld [vmem:[%s3522_s3 + $0x9] ss:$0 sm:$0xff] }
  0x22   : > { %2776 = vmatprep.subr.bf16.mxu0 %v2983_v3  ;;  %2782 = vmatprep.subr.bf16.mxu1 %v2983_v3 }
  0x24   : > { %2591 = vmatmul.mubr.msk.f32.vlgmr.msra.gmra.mrb[2].mxu0 %vm344_vm1, %v3128_v18  ;;  %2602 = vmatmul.mubr.msk.f32.vlgmr.msra.gmra.mrb[2].mxu1 %vm344_vm1, %v3128_v18 }
  0x25   : > { %2778 = vmatpush3.bf16.msra.mxu0 %v2777_v31  ;;  %2784 = vmatpush3.bf16.msra.mxu1 %v2783_v32  ;;  %v2418_v32 = vld [vmem:[%s3522_s3 + $0x6] ss:$0 sm:$0xff] }
  0x26   : > { %2779 = vmatprep.subr.bf16.mxu0 %v2983_v3  ;;  %2785 = vmatprep.subr.bf16.mxu1 %v2983_v3 }
  0x27   : > { %2612 = vmatprep.mubr.msk.f32.mxu0 %vm2984_vm0, %v2985_v11  ;;  %2623 = vmatprep.mubr.msk.f32.mxu1 %vm2984_vm0, %v2985_v11 }
  0x29   : > { %2781 = vmatpush3.bf16.msra.mxu0 %v2780_v37  ;;  %2787 = vmatpush3.bf16.msra.mxu1 %v2786_v38 }
  0x2a   : > { %2788 = vmatprep.subr.bf16.mxu0 %v2983_v3  ;;  %2794 = vmatprep.subr.bf16.mxu1 %v2983_v3 }
  0x2c   : > { %2613 = vmatmul.mubr.msk.f32.vlgmr.msra.gmra.mrb[4].mxu0 %vm344_vm1, %v3128_v18  ;;  %2624 = vmatmul.mubr.msk.f32.vlgmr.msra.gmra.mrb[4].mxu1 %vm344_vm1, %v3128_v18 }
  0x2d   : > { %2790 = vmatpush3.bf16.msra.mxu0 %v2789_v43  ;;  %2796 = vmatpush3.bf16.msra.mxu1 %v2795_v44  ;;  %v2444_v44 = vld [vmem:[%s3522_s3 + $0x8] ss:$0 sm:$0xff] }
  0x2e   : > { %2791 = vmatprep.subr.bf16.mxu0 %v2983_v3  ;;  %2797 = vmatprep.subr.bf16.mxu1 %v2983_v3 }
  0x2f   : > { %2634 = vmatprep.mubr.msk.f32.mxu0 %vm2984_vm0, %v2985_v11  ;;  %2645 = vmatprep.mubr.msk.f32.mxu1 %vm2984_vm0, %v2985_v11 }
  0x31   : > { %2793 = vmatpush3.bf16.msra.mxu0 %v2792_v49  ;;  %2799 = vmatpush3.bf16.msra.mxu1 %v2798_v50 }
  0x32   : > { %2800 = vmatprep.subr.bf16.mxu0 %v2983_v3  ;;  %2806 = vmatprep.subr.bf16.mxu1 %v2983_v3 }
  0x34   : > { %2635 = vmatmul.mubr.msk.f32.vlgmr.msra.gmra.mrb[6].mxu0 %vm344_vm1, %v3128_v18  ;;  %2646 = vmatmul.mubr.msk.f32.vlgmr.msra.gmra.mrb[6].mxu1 %vm344_vm1, %v3128_v18 }
  0x35   : > { %2802 = vmatpush3.bf16.msra.mxu0 %v2801_v55  ;;  %2808 = vmatpush3.bf16.msra.mxu1 %v2807_v56  ;;  %v2452_v56 = vld [vmem:[%s298_s18] ss:$0 sm:$0xff]  ;;  %s2893_s18 = scalar_lea.vmem %s2892_s17, 256 }
  0x36   : > { %2803 = vmatprep.subr.bf16.mxu0 %v2983_v3  ;;  %2809 = vmatprep.subr.bf16.mxu1 %v2983_v3  ;;  %p2895_p1 = scmp.lt.s32.totalorder %s2893_s18, %s2887_s14 }
  0x37   : > { %2656 = vmatprep.mubr.msk.f32.mxu0 %vm2984_vm0, %v2985_v11  ;;  %2667 = vmatprep.mubr.msk.f32.mxu1 %vm2984_vm0, %v2985_v11 }
  0x38   : > { %p2896_p2 = por %p2895_p1, %p2894_p0 }
  0x39   : > { %2805 = vmatpush3.bf16.msra.mxu0 %v2804_v60  ;;  %2811 = vmatpush3.bf16.msra.mxu1 %v2810_v62 }
  0x3a   : > { %2812 = vmatprep.subr.bf16.mxu0 %v2983_v3  ;;  %2818 = vmatprep.subr.bf16.mxu1 %v2983_v3  ;;  %p2897_p3 = pnand %p2896_p2, %p2890_p13 }
  0x3c   : > { %2657 = vmatmul.mubr.msk.f32.vlgmr.msra.gmra.mrb[8].mxu0 %vm344_vm1, %v3128_v18  ;;  %2668 = vmatmul.mubr.msk.f32.vlgmr.msra.gmra.mrb[8].mxu1 %vm344_vm1, %v3128_v18 }
  0x3d   : > { %2814 = vmatpush3.bf16.msra.mxu0 %v2813_v2  ;;  %2820 = vmatpush3.bf16.msra.mxu1 %v2819_v5 }
  0x3e   : > { %2815 = vmatprep.subr.bf16.mxu0 %v2983_v3  ;;  %2821 = vmatprep.subr.bf16.mxu1 %v2983_v3 }
  0x3f   : > { %2678 = vmatprep.mubr.msk.f32.mxu0 %vm2984_vm0, %v2985_v11  ;;  %2689 = vmatprep.mubr.msk.f32.mxu1 %vm2984_vm0, %v2985_v11 }
  0x41   : > { %2817 = vmatpush3.bf16.msra.mxu0 %v2816_v9  ;;  %2823 = vmatpush3.bf16.msra.mxu1 %v2822_v12 }
  0x42   : > { %2692 = vmatprep.subr.mxu0 %v2985_v11  ;;  %2697 = vmatprep.subr.mxu1 %v2985_v11 }
  0x44   : > { %2679 = vmatmul.mubr.msk.f32.vlgmr.msra.gmra.mrb[10].mxu0 %vm344_vm1, %v3128_v18  ;;  %2690 = vmatmul.mubr.msk.f32.vlgmr.msra.gmra.mrb[10].mxu1 %vm344_vm1, %v3128_v18  ;;  %v2417_v18 = vld [vmem:[%s3522_s3 + $0x5] ss:$0 sm:$0xff] }
  0x45   : > { %2694 = vmatprep.mubr.msk.f32.mxu0 %vm2984_vm0, %v2985_v11  ;;  %2699 = vmatprep.mubr.msk.f32.mxu1 %vm2984_vm0, %v2985_v11 }
  0xef   : > { %v414_v3 = vpop.f32.mrb[0].mxu0  ;;  %v484_v14 = vpop.f32.mrb[0].mxu1 }
  0xf0   : > { %v2570_v13 = vpop.f32.mrb[1].mxu0  ;;  %v2581_v15 = vpop.f32.mrb[1].mxu1  ;;  %v415_v30 = vadd.f32 %v2388_v23, %v414_v3  ;;  %v485_v31 = vadd.f32 %v2389_v27, %v484_v14 }
  0xf7   : > { %v554_v16 = vpop.f32.mrb[2].mxu0  ;;  %v624_v19 = vpop.f32.mrb[2].mxu1 }
  0xf8   : > { %v2592_v17 = vpop.f32.mrb[3].mxu0  ;;  %v2603_v20 = vpop.f32.mrb[3].mxu1  ;;  %v555_v42 = vadd.f32 %v2390_v35, %v554_v16  ;;  %v625_v43 = vadd.f32 %v2391_v39, %v624_v19 }
  0xff   : > { %v740_v22 = vpop.f32.mrb[4].mxu0  ;;  %v810_v25 = vpop.f32.mrb[4].mxu1 }
 0x100   : > { %v741_v24 = vadd.f32 %v2416_v21, %v740_v22  ;;  %v2614_v26 = vpop.f32.mrb[5].mxu0  ;;  %v811_v28 = vadd.f32 %v2417_v18, %v810_v25  ;;  %v2625_v29 = vpop.f32.mrb[5].mxu1 }
 0x102   : > { %2693 = vmatpush3.xpose.msk.msra.mxu0 %vm1287_vm2, %v741_v24  ;;  %2698 = vmatpush3.xpose.msk.msra.mxu1 %vm1287_vm2, %v811_v28 }
 0x103   : > { %2702 = vmatprep.subr.mxu0 %v2985_v11  ;;  %2707 = vmatprep.subr.mxu1 %v2985_v11 }
 0x105   : > { %2695 = vmatmul.mubr.msk.f32.vlgmr.msra.gmra.mrb[12].mxu0 %vm1287_vm2, %v415_v30  ;;  %2700 = vmatmul.mubr.msk.f32.vlgmr.msra.gmra.mrb[12].mxu1 %vm1287_vm2, %v485_v31 }
 0x106   : > { %2704 = vmatprep.mubr.msk.f32.mxu0 %vm2984_vm0, %v2985_v11  ;;  %2709 = vmatprep.mubr.msk.f32.mxu1 %vm2984_vm0, %v2985_v11 }
 0x107   : > { %v880_v34 = vpop.f32.mrb[6].mxu0  ;;  %v950_v37 = vpop.f32.mrb[6].mxu1 }
 0x108   : > { %v881_v36 = vadd.f32 %v2418_v32, %v880_v34  ;;  %v2636_v38 = vpop.f32.mrb[7].mxu0  ;;  %v951_v40 = vadd.f32 %v2419_v33, %v950_v37  ;;  %v2647_v41 = vpop.f32.mrb[7].mxu1  ;;  %v2446_v33 = vld [vmem:[%s3522_s3 + $0xa] ss:$0 sm:$0xff] }
 0x109   : > { %v2447_v38 = vld [vmem:[%s3522_s3 + $0xb] ss:$0 sm:$0xff] }
 0x10a   : > { %2703 = vmatpush3.xpose.msk.msra.mxu0 %vm1287_vm2, %v881_v36  ;;  %2708 = vmatpush3.xpose.msk.msra.mxu1 %vm1287_vm2, %v951_v40 }
 0x10b   : > { %2712 = vmatprep.subr.mxu0 %v2985_v11  ;;  %2717 = vmatprep.subr.mxu1 %v2985_v11 }
 0x10d   : > { %2705 = vmatmul.mubr.msk.f32.vlgmr.msra.gmra.mrb[14].mxu0 %vm1287_vm2, %v555_v42  ;;  %2710 = vmatmul.mubr.msk.f32.vlgmr.msra.gmra.mrb[14].mxu1 %vm1287_vm2, %v625_v43 }
 0x10e   : > { %2714 = vmatprep.mubr.msk.f32.mxu0 %vm2984_vm0, %v2985_v11  ;;  %2719 = vmatprep.mubr.msk.f32.mxu1 %vm2984_vm0, %v2985_v11 }
 0x10f   : > { %v1066_v46 = vpop.f32.mrb[8].mxu0  ;;  %v1136_v49 = vpop.f32.mrb[8].mxu1 }
 0x110   : > { %v1067_v47 = vadd.f32 %v2444_v44, %v1066_v46  ;;  %v2658_v48 = vpop.f32.mrb[9].mxu0  ;;  %v1137_v50 = vadd.f32 %v2445_v45, %v1136_v49  ;;  %v2669_v51 = vpop.f32.mrb[9].mxu1 }
 0x112   : > { %2713 = vmatpush3.msra.mxu0 %v1067_v47  ;;  %2718 = vmatpush3.msra.mxu1 %v1137_v50 }
 0x113   : > { %2722 = vmatprep.subr.mxu0 %v2985_v11  ;;  %2727 = vmatprep.subr.mxu1 %v2985_v11 }
 0x117   : > { %v3360_v52 = vpop.f32.mrb[10].mxu0  ;;  %v3362_v53 = vpop.f32.mrb[10].mxu1 }
 0x118   : > { %v2680_v54 = vpop.f32.mrb[11].mxu0  ;;  %v2691_v55 = vpop.f32.mrb[11].mxu1  ;;  %v1207_v37 = vadd.f32 %v2446_v33, %v3360_v52  ;;  %v1277_v41 = vadd.f32 %v2447_v38, %v3362_v53 }
 0x119   : > { %v1928_v54 = vld [vmem:[%s3523_s4] sm:$0xff]  ;;  %v1929_v55 = vld [vmem:[%s3523_s4 + $0x8] sm:$0xff] }
 0x1d8   : > { %v1360_v57 = vpop.f32.mrb[12].mxu0  ;;  %v1436_v59 = vpop.f32.mrb[12].mxu1 }
 0x1d9   : > { %v1361_v58 = vadd.f32 %v2452_v56, %v1360_v57  ;;  %v2696_v60 = vpop.f32.mrb[13].mxu0  ;;  %v2701_v61 = vpop.f32.mrb[13].mxu1  ;;  %v1437_v62 = vadd.f32 %v2452_v56, %v1436_v59  ;;  %v1931_v59 = vld [vmem:[%s3523_s4 + $0x18] sm:$0xff] }
 0x1db   : > { %v1592_v63 = vsel %vm1287_vm2, %v1361_v58, -inf  ;;  %v1595_v0 = vsel %vm1287_vm2, %v1437_v62, -inf }
 0x1dc   : > { %1593 = vmax.xlane.f32.xlu0 %v1592_v63 }
 0x1e0   : > { %1596 = vmax.xlane.f32.xlu0 %v1595_v0  ;;  %v1512_v1 = vpop.f32.mrb[14].mxu0  ;;  %v1588_v2 = vpop.f32.mrb[14].mxu1 }
 0x1e1   : > { %v1513_v4 = vadd.f32 %v2452_v56, %v1512_v1  ;;  %v2706_v5 = vpop.f32.mrb[15].mxu0  ;;  %v2711_v6 = vpop.f32.mrb[15].mxu1  ;;  %v1589_v7 = vadd.f32 %v2452_v56, %v1588_v2  ;;  %v1930_v56 = vld [vmem:[%s3523_s4 + $0x10] sm:$0xff] }
 0x1e3   : > { %v1598_v8 = vsel %vm1287_vm2, %v1513_v4, -inf  ;;  %v1601_v9 = vsel %vm1287_vm2, %v1589_v7, -inf }
 0x1e4   : > { %1599 = vmax.xlane.f32.xlu1 %v1598_v8 }
 0x1e8   : > { %1602 = vmax.xlane.f32.xlu1 %v1601_v9 }
 0x269   : > { %v1594_v10 = vpop.xlane.xlu0 %1593 }
 0x26a   : > { %v1604_v12 = vsub.f32 %v1361_v58, %v1594_v10 }
 0x26c   : > { %v1608_v3 = vmul.f32 1.442695, %v1604_v12 }
 0x26d   : > { %v1597_v13 = vpop.xlane.xlu0 %1596 }
 0x26e   : > { %2871 = vpow2.f32 %v1608_v3  ;;  %v1605_v14 = vsub.f32 %v1437_v62, %v1597_v13 }
 0x270   : > { %v1610_v15 = vmul.f32 1.442695, %v1605_v14 }
 0x271   : > { %v1600_v16 = vpop.xlane.xlu1 %1599 }
 0x272   : > { %2873 = vpow2.f32 %v1610_v15  ;;  %v1606_v17 = vsub.f32 %v1513_v4, %v1600_v16 }
 0x274   : > { %v1612_v19 = vmul.f32 1.442695, %v1606_v17 }
 0x275   : > { %v1603_v20 = vpop.xlane.xlu1 %1602 }
 0x276   : > { %2875 = vpow2.f32 %v1612_v19  ;;  %v1607_v21 = vsub.f32 %v1589_v7, %v1603_v20 }
 0x278   : > { %v2872_v18 = vpop.eup %2871  ;;  %v1614_v22 = vmul.f32 1.442695, %v1607_v21 }
 0x279   : > { %v1616_v23 = vsel %vm1287_vm2, %v2872_v18, 0.0 }
 0x27a   : > { %2877 = vpow2.f32 %v1614_v22  ;;  %1617 = vadd.xlane.f32.xlu0 %v1616_v23 }
 0x27c   : > { %v2874_v24 = vpop.eup %2873 }
 0x27d   : > { %v1619_v25 = vsel %vm1287_vm2, %v2874_v24, 0.0 }
 0x27e   : > { %1620 = vadd.xlane.f32.xlu1 %v1619_v25 }
 0x280   : > { %v2876_v26 = vpop.eup %2875 }
 0x281   : > { %v1622_v27 = vsel %vm1287_vm2, %v2876_v26, 0.0 }
 0x282   : > { %1623 = vadd.xlane.f32.xlu0 %v1622_v27 }
 0x284   : > { %v2878_v28 = vpop.eup %2877 }
 0x285   : > { %v1625_v29 = vsel %vm1287_vm2, %v2878_v28, 0.0 }
 0x286   : > { %1626 = vadd.xlane.f32.xlu1 %v1625_v29 }
 0x307   : > { %v1618_v30 = vpop.xlane.xlu0 %1617 }
 0x308   : > { %2879 = vrcp.f32 %v1618_v30 }
 0x30b   : > { %v1621_v31 = vpop.xlane.xlu1 %1620 }
 0x30c   : > { %2881 = vrcp.f32 %v1621_v31 }
 0x30f   : > { %v1624_v32 = vpop.xlane.xlu0 %1623 }
 0x310   : > { %2883 = vrcp.f32 %v1624_v32 }
 0x312   : > { %v2880_v34 = vpop.eup %2879 }
 0x313   : > { %v1632_v35 = vmul.f32 %v2880_v34, %v2872_v18  ;;  %v1627_v36 = vpop.xlane.xlu1 %1626 }
 0x314   : > { %2885 = vrcp.f32 %v1627_v36 }
 0x315   : > { %2715 = vmatmul.mubr.msk.f32.vlgmr.msra.gmra.mrb[16].mxu0 %vm1287_vm2, %v1632_v35  ;;  %v2240_v45 = vsel %vm1287_vm2, %v1632_v35, 0.0 }
 0x316   : > { %v2882_v39 = vpop.eup %2881  ;;  %2723 = vmatpush3.msra.mxu0 %v1207_v37  ;;  %2724 = vmatprep.mubr.msk.f32.mxu0 %vm2984_vm0, %v2985_v11 }
 0x317   : > { %v1633_v40 = vmul.f32 %v2882_v39, %v2874_v24  ;;  %2732 = vmatprep.subr.mxu0 %v2985_v11 }
 0x319   : > { %2720 = vmatmul.mubr.msk.f32.vlgmr.msra.gmra.mrb[16].mxu1 %vm1287_vm2, %v1633_v40  ;;  %v2241_v44 = vsel %vm1287_vm2, %v1633_v40, 0.0 }
 0x31a   : > { %v2884_v42 = vpop.eup %2883  ;;  %2728 = vmatpush3.msra.mxu1 %v1277_v41  ;;  %2729 = vmatprep.mubr.msk.f32.mxu1 %vm2984_vm0, %v2985_v11  ;;  %v2242_v48 = vadd.f32 %v2241_v44, %v2240_v45 }
 0x31b   : > { %v1634_v43 = vmul.f32 %v2884_v42, %v2876_v26  ;;  %2737 = vmatprep.subr.mxu1 %v2985_v11 }
 0x31d   : > { %2725 = vmatmul.mubr.msk.f32.vlgmr.msra.gmra.mrb[18].mxu0 %vm1287_vm2, %v1634_v43  ;;  %v2243_v46 = vsel %vm1287_vm2, %v1634_v43, 0.0 }
 0x31e   : > { %v2886_v47 = vpop.eup %2885  ;;  %2734 = vmatprep.mubr.msk.f32.mxu0 %vm2984_vm0, %v2985_v11  ;;  %v2244_v50 = vadd.f32 %v2243_v46, %v2242_v48  ;;  %2733 = vmatpush3.msra.mxu0 %v1928_v54 }
 0x31f   : > { %v1635_v49 = vmul.f32 %v2886_v47, %v2878_v28  ;;  %2742 = vmatprep.subr.mxu0 %v2985_v11 }
 0x321   : > { %2730 = vmatmul.mubr.msk.f32.vlgmr.msra.gmra.mrb[18].mxu1 %vm1287_vm2, %v1635_v49  ;;  %v2245_v51 = vsel %vm1287_vm2, %v1635_v49, 0.0 }
 0x322   : > { %2739 = vmatprep.mubr.msk.f32.mxu1 %vm2984_vm0, %v2985_v11  ;;  %v2246_v52 = vadd.f32 %v2245_v51, %v2244_v50  ;;  %2738 = vmatpush3.msra.mxu1 %v1929_v55 }
 0x323   : > { %2747 = vmatprep.subr.mxu1 %v2985_v11 }
 0x324   : > { %v2247_v53 = vmul.f32 0.25, %v2246_v52 }
 0x326   : > { %2248 = vst.msk [vmem:[%s3408_s29] sm:$0xff] %vm1287_vm2, %v2247_v53 }
 0x3e8   : > { %v1705_v57 = vpop.f32.mrb[16].mxu0 }
 0x3e9   : > { %v2716_v58 = vpop.f32.mrb[17].mxu0  ;;  %2735 = vmatmul.mubr.msk.f32.vlgmr.msra.gmra.mrb[20].mxu0 %vm1287_vm2, %v1705_v57 }
 0x3ea   : > { %2743 = vmatpush3.msra.mxu0 %v1930_v56  ;;  %2744 = vmatprep.mubr.msk.f32.mxu0 %vm2984_vm0, %v2985_v11 }
 0x3ec   : > { %v1778_v60 = vpop.f32.mrb[16].mxu1 }
 0x3ed   : > { %v2721_v61 = vpop.f32.mrb[17].mxu1  ;;  %2740 = vmatmul.mubr.msk.f32.vlgmr.msra.gmra.mrb[20].mxu1 %vm1287_vm2, %v1778_v60 }
 0x3ee   : > { %2748 = vmatpush3.msra.mxu1 %v1931_v59  ;;  %2749 = vmatprep.mubr.msk.f32.mxu1 %vm2984_vm0, %v2985_v11 }
 0x3f0   : > { %v1851_v62 = vpop.f32.mrb[18].mxu0 }
 0x3f1   : > { %v2726_v63 = vpop.f32.mrb[19].mxu0  ;;  %2745 = vmatmul.mubr.msk.f32.vlgmr.msra.gmra.mrb[22].mxu0 %vm1287_vm2, %v1851_v62 }
 0x3f4   : > { %v1924_v0 = vpop.f32.mrb[18].mxu1 }
 0x3f5   : > { %v2731_v1 = vpop.f32.mrb[19].mxu1  ;;  %2750 = vmatmul.mubr.msk.f32.vlgmr.msra.gmra.mrb[22].mxu1 %vm1287_vm2, %v1924_v0 }
 0x3f6   : > { %2900 = shalt.err (!%p2897_p3)
}
 0x3f7   : > { %s2901_s29 = scalar_lea.hbm %s3440_s8, 128  ;;  %s2905_s21 = scalar_lea.hbm %s3526_s7, 256 }
 0x3f8   : > { %p2902_p4 = scmp.ne.s32.totalorder %s3440_s8, %s2901_s29  ;;  %p2906_p9 = scmp.lt.u32.totalorder %s3440_s8, %s3526_s7 }
 0x3f9   : > { %p2907_p10 = scmp.lt.u32.totalorder %s2905_s21, %s2901_s29  ;;  %p2909_p12 = scmp.lt.u32.totalorder %s2901_s29, %s3440_s8 }
 0x3fa   : > { %p2903_p7 = pnand %p2902_p4, %p3066_p5 }
 0x3fb   : > { %p2908_p11 = por %p2907_p10, %p2906_p9 }
 0x3fc   : > { %p2904_p8 = pneg %p2903_p7 }
 0x3fd   : > { %p2910_p13 = por %p2909_p12, %p2908_p11 }
 0x3ff   : > { %p2911_p0 = pnand %p2910_p13, %p2904_p8 }
 0x401   : > { %2914 = shalt.err (!%p2911_p0)
}
 0x402   : > { %2825 = dma.vmem_to_hbm [thread:$0]  (%p3066_p5), %s2282_s9, 128, %s3440_s8, %s2255_s13   ;;  %v2469_v15 = vld [vmem:[%s3524_s5] ss:$0 sm:$0xff] }
 0x403   : > { %s284_s13 = scalar_lea.vmem [#allocation2], %s2385_s23  ;;  %s3475_s15 = scalar_lea.hbm %s3525_s6, %s2472_s19 }
 0x404   : > { %s2268_s14 = sshll.u32 %s284_s13, 4  ;;  %s2250_s20 = scalar_lea.sflag [#allocation3], %s3395_s22  ;;  %s3477_s14 = int_to_ptr.vmem [resolvable:$true] %s2268_s14 }
 0x405   : > { %s2915_s21 = scalar_lea.vmem %s3477_s14, 128  ;;  %s2987_s23 = smov [#allocation2]  }
 0x406   : > { %p2916_p1 = scmp.ne.s32.totalorder %s3477_s14, %s2915_s21  ;;  %s2919_s28 = sshll.u32 %s2987_s23, 4  ;;  %s2920_s28 = int_to_ptr.vmem [resolvable:$false] %s2919_s28 }
 0x407   : > { %s2921_s16 = scalar_lea.vmem %s2920_s28, 256  ;;  %p2922_p4 = scmp.lt.s32.totalorder %s3477_s14, %s2920_s28 }
 0x408   : > { %p2917_p2 = pnand %p2916_p1, %p3066_p5  ;;  %p2923_p7 = scmp.lt.s32.totalorder %s2921_s16, %s2915_s21 }
 0x40a   : > { %p2918_p3 = pneg %p2917_p2  ;;  %p2924_p8 = por %p2923_p7, %p2922_p4 }
 0x40c   : > { %p2925_p9 = pnand %p2924_p8, %p2918_p3 }
 0x4bc   : > { %v2001_v11 = vpop.f32.mrb[20].mxu0 }
 0x4bd   : > { %v2736_v2 = vpop.f32.mrb[21].mxu0  ;;  %v2224_v5 = vsel %vm344_vm1, %v2001_v11, 0.0 }
 0x4c0   : > { %v2074_v4 = vpop.f32.mrb[20].mxu1 }
 0x4c1   : > { %v2225_v6 = vsel %vm344_vm1, %v2074_v4, 0.0  ;;  %v2741_v7 = vpop.f32.mrb[21].mxu1 }
 0x4c2   : > { %v2226_v8 = vadd.f32 %v2225_v6, %v2224_v5 }
 0x4c4   : > { %v2147_v9 = vpop.f32.mrb[22].mxu0 }
 0x4c5   : > { %v2227_v10 = vsel %vm344_vm1, %v2147_v9, 0.0  ;;  %v2746_v12 = vpop.f32.mrb[23].mxu0 }
 0x4c6   : > { %v2228_v3 = vadd.f32 %v2227_v10, %v2226_v8 }
 0x4c8   : > { %v2220_v13 = vpop.f32.mrb[22].mxu1 }
 0x4c9   : > { %v2229_v14 = vsel %vm344_vm1, %v2220_v13, 0.0  ;;  %v2751_v16 = vpop.f32.mrb[23].mxu1 }
 0x4ca   : > { %v2230_v17 = vadd.f32 %v2229_v14, %v2228_v3 }
 0x4cc   : > { %v2238_v19 = vadd.f32 %v2469_v15, %v2230_v17 }
 0x4ce   : > { %2239 = vst.msk [vmem:[%s284_s13] sm:$0xff] %vm344_vm1, %v2238_v19 }
 0x4cf   : > { %2928 = shalt.err (!%p2925_p9)
}
 0x4d0   : > { %s2929_s22 = scalar_lea.hbm %s3475_s15, 128  ;;  %s2933_s8 = scalar_lea.hbm %s3525_s6, 256 }
 0x4d1   : > { %p2930_p10 = scmp.ne.s32.totalorder %s3475_s15, %s2929_s22  ;;  %p2934_p13 = scmp.lt.u32.totalorder %s3475_s15, %s3525_s6 }
 0x4d2   : > { %p2935_p0 = scmp.lt.u32.totalorder %s2933_s8, %s2929_s22  ;;  %p2937_p2 = scmp.lt.u32.totalorder %s2929_s22, %s3475_s15 }
 0x4d3   : > { %p2931_p11 = pnand %p2930_p10, %p3066_p5 }
 0x4d4   : > { %p2936_p1 = por %p2935_p0, %p2934_p13 }
 0x4d5   : > { %p2932_p12 = pneg %p2931_p11 }
 0x4d6   : > { %p2938_p3 = por %p2937_p2, %p2936_p1 }
 0x4d8   : > { %p2939_p4 = pnand %p2938_p3, %p2932_p12 }
 0x4da   : > { %2942 = shalt.err (!%p2939_p4)
}
 0x4db   : > { %2824 = dma.vmem_to_hbm [thread:$0]  (%p3066_p5), %s3477_s14, 128, %s3475_s15, %s2250_s20  }
 0x4dc PF: > { %p2835_p7 = scmp.ge.s32.totalorder %s2981_s27, 2  ;;  %s2293_s18 = sand.u32 1, %s2969_s24  }
 0x4dd   : > { %s2294_s29 = scalar_lea.sflag [#allocation3], %s2293_s18 }
 0x4de   : > { %p2829_p8 = pnand %p2835_p7, %p3070_p6 }
 0x4e0   : > { %2960 = dma.done.wait (!%p2829_p8), %s2294_s29, 128  }
 0x4e1   : > { %2962 = vsyncadd (!%p2829_p8), %s2294_s29, 4294967168  ;;  %s2303_s21 = scalar_lea.sflag [#allocation5], %s2293_s18 }
 0x4e2   : > { %2964 = dma.done.wait (!%p2829_p8), %s2303_s21, 128  }
 0x4e3   : > { %2966 = vsyncadd (!%p2829_p8), %s2303_s21, 4294967168  ;;  %p21_p5 = scmp.ge.s32.totalorder %s3053_s30, 4   ;;  %s3529_s24 = smov %s2973_s25 }
 0x4e4   : > { %s3530_s25 = smov %s2977_s26  ;;  %s3531_s26 = smov %s3064_s10 }
 0x4e5   : > { %s3532_s27 = smov %s3053_s30  ;;  %23 = sbr.rel (!%p21_p5) target bundleno = 5 (0x5), region = 103 }
 0x4ec   :  { %2308 = vsyncpa [#allocation3], 1 }
 0x4ed   :  { %2310 = vsyncpa [#allocation3 + $0x1], 1 }
 0x4ee   :  { %2311 = vsyncpa [#allocation5], 1 }
 0x4ef   :  { %2313 = vsyncpa [#allocation5 + $0x1], 1 }

</bundles_post_ra>
